<compile_context>
chip_gen: v5e
topology: v5e:2x2
jax: 0.10.0
libtpu: 0.0.40
codegen_flags: <defaults>
</compile_context>

<pallas_src>
import functools
import numpy as np

import jax
import jax.numpy as jnp
from jax import lax
from jax.experimental import pallas as pl
from jax.experimental.pallas import tpu as pltpu


def conv_block_kernel(x_ref, fused_ref, bdiff_ref, wbin_ref, sbin_ref, cst_ref,
                      slope_ref, out_ref, *, img_h):
    # x_ref / out_ref block: (B*H, W*C) -- B whole images stacked along the row (sublane) axis,
    # fully lane-dense, so every matmul has M = B*H rows.
    BH, WC = out_ref.shape
    nimg = BH // img_h
    x = x_ref[...]                                          # (BH, WC) f32

    # Image-local row index -> validity of the h-1 / h+1 contributions (also zeroes the
    # pltpu.roll wrap-around between stacked images and at the block edges).
    h_idx = lax.broadcasted_iota(jnp.int32, (nimg, img_h, 2 * WC), 1).reshape(BH, 2 * WC)
    top_mask = (h_idx > 0).astype(jnp.float32)              # row h-1 exists within the image
    bot_mask = (h_idx < img_h - 1).astype(jnp.float32)      # row h+1 exists within the image

    def band_conv(lhs, w_ref, tmask, bmask):
        # 3x3 "same" conv as three *aligned* (BH, WC) x (WC, K) matmuls (one per kernel-row
        # offset dh); zero padding along W is pre-folded into the banded weights. The h+/-1 row
        # alignment is done on the matmul results with XLU sublane rolls (bit-exact row
        # reordering) instead of sublane-offset LHS slices (which force relayout copies).
        y0 = jnp.dot(lhs, w_ref[0], preferred_element_type=jnp.float32)
        y1 = jnp.dot(lhs, w_ref[1], preferred_element_type=jnp.float32)
        y2 = jnp.dot(lhs, w_ref[2], preferred_element_type=jnp.float32)
        up = pltpu.roll(y0, shift=1, axis=0) * tmask              # up[h]  = y0[h-1]
        dn = pltpu.roll(y2, shift=BH - 1, axis=0) * bmask         # dn[h]  = y2[h+1] (roll by -1)
        return y1 + up + dn

    # ---- one fused 2*WC-wide f32 band: [LAB difference | (1x1 o grouped-dw)] -------------------
    # Shares a single LHS read and fills a 256-lane MXU pass on v6e/v7x.
    acc = band_conv(x, fused_ref, top_mask, bot_mask)       # (BH, 2*WC)
    d = acc[:, :WC] + bdiff_ref[...]                        # LAB margin (odd - even channel)
    fp = acc[:, WC:]                                        # path_1 result

    # ---- LAB sign -> +/-1 activations; binary 3x3 conv in bf16 on the MXU (exact for +/-1) -----
    # TODO(synk): an int8 band (v5e/v6e, 2x MXU rate) or fp8 band (v7x) is also exact for +/-1;
    #             bf16 kept here as the single portable code path.
    a = jnp.where(d > 0.0, 1.0, -1.0).astype(jnp.bfloat16)  # ties -> -1 (torch argmax picks idx 0)
    acc_bin = band_conv(a, wbin_ref, top_mask[:, :WC], bot_mask[:, :WC])

    # ---- alpha*Scale + bias + PReLU + residual --------------------------------------------------
    s = acc_bin * sbin_ref[...] + (fp + cst_ref[...])
    act = jnp.where(s > 0.0, s, slope_ref[...] * s)
    out_ref[...] = act + x                                  # unmasked, lane-dense store


def conv_block_pallas(x_nchw, params, block_batch=None):
    """x_nchw: (N, C, H, W) float32 -> (N, C, H, W) float32."""
    fused_band, bdiff_t, wbin_band, sbin_t, cst_t, slope_t = params
    N, C, H, W = x_nchw.shape
    WC = W * C

    # Batch several images per grid step so the MXU M dimension is B*H instead of H, while
    # keeping >= 2 grid steps (when N allows) so v7x's two TensorCores both get work.
    if block_batch is None:
        block_batch = 1
        for b in range(2, N + 1):
            if N % b == 0 and N // b >= 2 and b * H <= 256:
                block_batch = b
    assert N % block_batch == 0
    grid_n = N // block_batch
    BH = block_batch * H

    # NCHW -> (N*H, W*C): channels innermost so lane index = w*C + c (lane-dense, 128 lanes).
    # TODO(synk): when ConvBlocks are stacked, keep activations in this layout between blocks and
    #             only convert at the network boundary (each transpose is an extra HBM pass).
    x_flat = jnp.transpose(x_nchw, (0, 2, 3, 1)).reshape(N * H, WC).astype(jnp.float32)

    grid_spec = pltpu.PrefetchScalarGridSpec(
        num_scalar_prefetch=0,
        grid=(grid_n,),
        in_specs=[
            pl.BlockSpec((BH, WC), lambda n: (n, 0)),            # B stacked input images
            pl.BlockSpec((3, WC, 2 * WC), lambda n: (0, 0, 0)),  # fused f32 band [dlab | 1x1+dw]
            pl.BlockSpec((1, WC), lambda n: (0, 0)),             # LAB difference bias (tiled)
            pl.BlockSpec((3, WC, WC), lambda n: (0, 0, 0)),      # binary sign band (bf16, +/-1)
            pl.BlockSpec((1, WC), lambda n: (0, 0)),             # alpha * Scale.variance (tiled)
            pl.BlockSpec((1, WC), lambda n: (0, 0)),             # variance*bias + mean (tiled)
            pl.BlockSpec((1, WC), lambda n: (0, 0)),             # PReLU slope (tiled)
        ],
        out_specs=pl.BlockSpec((BH, WC), lambda n: (n, 0)),
    )

    out_flat = pl.pallas_call(
        functools.partial(conv_block_kernel, img_h=H),
        out_shape=jax.ShapeDtypeStruct((N * H, WC), jnp.float32),
        grid_spec=grid_spec,
        # Batch axis is independent -> "parallel" so v7x shards grid steps across its 2 TCs.
        # Weight blocks have constant index maps so they are DMA'd only once; at this size the
        # whole resident footprint is ~1 MiB, so default buffering is fine (pl.Buffered(1) on the
        # weight specs would trim it for much larger C*W).
        compiler_params=pltpu.CompilerParams(dimension_semantics=("parallel",)),
    )(x_flat, fused_band, bdiff_t, wbin_band, sbin_t, cst_t, slope_t)

    return jnp.transpose(out_flat.reshape(N, H, W, C), (0, 3, 1, 2))


# ---------------------------------------------------------------------------
# Wrapper-side parameter preparation (plain numpy/JAX glue, done once)
# ---------------------------------------------------------------------------
def _band_from_taps(w_t, W, C):
    """w_t: (3, 3, Cin, Cout) conv taps -> (3, W*C, W*C) banded matrices (numpy f32).

    band[dh][w_in*C + ci, w*C + co] = w_t[dh, w_in - w + 1, ci, co] for |w_in - w| <= 1, so a 3x3
    'same' conv becomes out[h] = sum_dh x[h + dh - 1] @ band[dh] (zero padding along W absorbed
    in the band; the h +/- 1 row terms are handled with rolls + boundary masks in the kernel).
    """
    band = np.zeros((3, W * C, W * C), np.float32)
    w_np = np.asarray(w_t, np.float32)
    for dh in range(3):
        for w in range(W):
            for dw in range(3):
                wi = w + dw - 1
                if 0 <= wi < W:
                    band[dh, wi * C:(wi + 1) * C, w * C:(w + 1) * C] = w_np[dh, dw]
    return band


def prepare_params(w_lab, b_lab, w_binraw, b_bin, sc_mean, sc_var, w_1x1, w_dw, prelu_a, gs, H, W):
    C = w_binraw.shape[0]

    def tile_c(v):  # per-channel vector -> (1, W*C), lane index w*C + c maps to v[c]
        return jnp.tile(jnp.asarray(v, jnp.float32), W).reshape(1, W * C)

    # LAB: only the (odd - even) channel-pair difference matters for the forward value.
    wl = np.asarray(w_lab, np.float32)
    wdiff = np.transpose(wl[1::2, 0] - wl[0::2, 0], (1, 2, 0))            # (3, 3, C)
    wdiff_full = np.zeros((3, 3, C, C), np.float32)
    for dh in range(3):
        for dw in range(3):
            wdiff_full[dh, dw] = np.diag(wdiff[dh, dw])                   # depthwise -> diag block
    dlab_band = _band_from_taps(wdiff_full, W, C)
    bl = np.asarray(b_lab, np.float32)
    bdiff_t = tile_c(bl[1::2] - bl[0::2])

    # Binary conv: pure +/-1 sign weights (exact in bf16); alpha and Scale folded post-matmul.
    wb = np.asarray(w_binraw, np.float32)
    alpha = np.mean(np.abs(wb), axis=(1, 2, 3))                           # L1 scale per out-ch
    wsign_t = np.transpose(np.sign(wb), (2, 3, 1, 0))                     # (3, 3, Cin, Cout)
    wbin_band = jnp.asarray(_band_from_taps(wsign_t, W, C), jnp.bfloat16)
    sbin_t = tile_c(alpha * np.asarray(sc_var, np.float32))
    cst_t = tile_c(np.asarray(sc_var, np.float32) * np.asarray(b_bin, np.float32)
                   + np.asarray(sc_mean, np.float32))

    # path_1: fold 1x1 conv into the grouped depthwise conv (exact: both linear, zero padding).
    w1_mat = np.asarray(w_1x1, np.float32)[:, :, 0, 0].T                  # (ci, cm)
    wd = np.asarray(w_dw, np.float32)                                     # (C, gs, 3, 3) grouped
    wdw_full = np.zeros((3, 3, C, C), np.float32)                         # (kh, kw, cm, co)
    for co in range(C):
        g = co // gs
        for cl in range(gs):
            wdw_full[:, :, g * gs + cl, co] = wd[co, cl]
    wcomb = np.einsum('ic,xyco->xyio', w1_mat, wdw_full)                  # (3, 3, ci, co)
    wcomb_band = _band_from_taps(wcomb, W, C)

    # Fuse the two f32 bands along the output axis -> one (3, WC, 2*WC) band: a single shared-LHS
    # matmul per kernel-row offset (fills a 256-lane MXU pass on v6e/v7x).
    # TODO(synk): if the f32 band dominates an MXU-bound profile, consider a bf16 hi+lo split.
    fused_band = jnp.asarray(np.concatenate([dlab_band, wcomb_band], axis=2), jnp.float32)

    slope_t = tile_c(prelu_a)
    return (fused_band, bdiff_t, wbin_band, sbin_t, cst_t, slope_t)


# ---------------------------------------------------------------------------
# Pure-JAX reference (lax convs, NCHW, mirrors the PyTorch forward exactly)
# ---------------------------------------------------------------------------
def conv_block_ref(x, raw):
    (w_lab, b_lab, w_binraw, b_bin, sc_mean, sc_var, w_1x1, w_dw, prelu_a, gs) = raw
    N, C, H, W = x.shape
    dn = ('NCHW', 'OIHW', 'NCHW')

    # LAB
    lab = lax.conv_general_dilated(x, w_lab, (1, 1), [(1, 1), (1, 1)],
                                   dimension_numbers=dn, feature_group_count=C)
    lab = lab + b_lab[None, :, None, None]
    lab = lab.reshape(N, C, 2, H, W)
    a = jnp.argmax(lab, axis=2).astype(jnp.float32) * 2.0 - 1.0

    # BinaryConv2d: binarize input (already +/-1) and weights (sign * L1 mean over dims 1,2,3)
    alpha = jnp.mean(jnp.abs(w_binraw), axis=(1, 2, 3))
    wb = jnp.sign(w_binraw) * alpha[:, None, None, None]
    z = lax.conv_general_dilated(jnp.sign(a), wb, (1, 1), [(1, 1), (1, 1)], dimension_numbers=dn)
    z = z + b_bin[None, :, None, None]
    path0 = sc_var[None, :, None, None] * z + sc_mean[None, :, None, None]

    # path_1
    p1 = lax.conv_general_dilated(x, w_1x1, (1, 1), [(0, 0), (0, 0)], dimension_numbers=dn)
    p1 = lax.conv_general_dilated(p1, w_dw, (1, 1), [(1, 1), (1, 1)], dimension_numbers=dn,
                                  feature_group_count=C // gs)

    s = path0 + p1
    act = jnp.where(s > 0, s, prelu_a[None, :, None, None] * s)
    return act + x


if __name__ == "__main__":
    N, C, H, W = 8, 8, 16, 16          # W*C = 128 -> lane-dense; N=8 -> 4 images per grid step
    gs = 2                             # group_size (groups = C // gs)

    key = jax.random.PRNGKey(0)
    ks = jax.random.split(key, 10)
    x = jax.random.normal(ks[0], (N, C, H, W), jnp.float32)

    # Parameters (shapes from the module's __init__), deterministic init
    w_lab = jax.random.normal(ks[1], (2 * C, 1, 3, 3), jnp.float32) * 0.3   # LAB depthwise conv
    b_lab = jax.random.normal(ks[2], (2 * C,), jnp.float32) * 0.1
    w_binraw = jax.random.normal(ks[3], (C, C, 3, 3), jnp.float32) * 0.2    # BinaryConv2d weight
    b_bin = jax.random.normal(ks[4], (C,), jnp.float32) * 0.1
    sc_mean = jax.random.normal(ks[5], (C,), jnp.float32) * 0.05            # Scale.mean
    sc_var = 1.0 + 0.1 * jax.random.normal(ks[6], (C,), jnp.float32)        # Scale.variance
    w_1x1 = jax.random.normal(ks[7], (C, C, 1, 1), jnp.float32) * 0.3
    w_dw = jax.random.normal(ks[8], (C, gs, 3, 3), jnp.float32) * 0.3       # grouped depthwise
    prelu_a = jnp.full((C,), 0.25, jnp.float32) + 0.05 * jax.random.normal(ks[9], (C,), jnp.float32)

    params = prepare_params(w_lab, b_lab, w_binraw, b_bin, sc_mean, sc_var,
                            w_1x1, w_dw, prelu_a, gs, H, W)

    out = jax.jit(functools.partial(conv_block_pallas, params=params))(x)
    out = jax.block_until_ready(out)

    # correctness check vs pure-JAX reference
    raw = (w_lab, b_lab, w_binraw, b_bin, sc_mean, sc_var, w_1x1, w_dw, prelu_a, gs)
    ref = jax.block_until_ready(conv_block_ref(x, raw))
    out_np = np.asarray(out)
    ref_np = np.asarray(ref)

    # Tie-region guard: the LAB +/-1 decision sign(y_odd - y_even) can differ from the reference
    # argmax only where the margin is within f32 rounding noise; exclude the 3x3 output
    # neighborhoods of such (rare) near-ties from the strict comparison.
    dn = ('NCHW', 'OIHW', 'NCHW')
    lab = lax.conv_general_dilated(x, w_lab, (1, 1), [(1, 1), (1, 1)],
                                   dimension_numbers=dn, feature_group_count=C)
    lab = np.asarray(lab + b_lab[None, :, None, None]).reshape(N, C, 2, H, W)
    margin = lab[:, :, 1] - lab[:, :, 0]
    unsafe = (np.abs(margin) <= 1e-4).any(axis=1)                        # (N, H, W)
    padm = np.pad(unsafe, ((0, 0), (1, 1), (1, 1)))
    dil = np.zeros_like(unsafe)
    for dh in range(3):
        for dw in range(3):
            dil |= padm[:, dh:dh + H, dw:dw + W]
    ok = np.broadcast_to(~dil[:, None, :, :], out_np.shape)
    assert ok.mean() > 0.99, "tie-region guard excluded too many outputs"
    np.testing.assert_allclose(out_np[ok], ref_np[ok], rtol=1e-3, atol=1e-3)

    print("KERNEL_OK")
</pallas_src>

<mosaic_0001>
module attributes {stable_mosaic.version = 11 : i64} {
  func.func @conv_block_kernel(%arg0: i32, %arg1: memref<64x128xf32, #tpu.memory_space<vmem>>, %arg2: memref<3x128x256xf32, #tpu.memory_space<vmem>>, %arg3: memref<1x128xf32, #tpu.memory_space<vmem>>, %arg4: memref<3x128x128xbf16, #tpu.memory_space<vmem>>, %arg5: memref<1x128xf32, #tpu.memory_space<vmem>>, %arg6: memref<1x128xf32, #tpu.memory_space<vmem>>, %arg7: memref<1x128xf32, #tpu.memory_space<vmem>>, %arg8: memref<64x128xf32, #tpu.memory_space<vmem>>) attributes {dimension_semantics = [#tpu.dimension_semantics<parallel>], iteration_bounds = array<i64: 2>, scalar_prefetch = 0 : i64, scratch_operands = 0 : i64, tpu.core_type = #tpu.core_type<tc>, window_params = [{transform_indices = @transform_0, window_bounds = array<i64: 64, 128>}, {pipeline_mode = #tpu.pipeline_mode<synchronous>, transform_indices = @transform_1, window_bounds = array<i64: 3, 128, 256>}, {pipeline_mode = #tpu.pipeline_mode<synchronous>, transform_indices = @transform_2, window_bounds = array<i64: 1, 128>}, {pipeline_mode = #tpu.pipeline_mode<synchronous>, transform_indices = @transform_3, window_bounds = array<i64: 3, 128, 128>}, {pipeline_mode = #tpu.pipeline_mode<synchronous>, transform_indices = @transform_4, window_bounds = array<i64: 1, 128>}, {pipeline_mode = #tpu.pipeline_mode<synchronous>, transform_indices = @transform_5, window_bounds = array<i64: 1, 128>}, {pipeline_mode = #tpu.pipeline_mode<synchronous>, transform_indices = @transform_6, window_bounds = array<i64: 1, 128>}, {transform_indices = @transform_7, window_bounds = array<i64: 64, 128>}]} {
    %c0 = arith.constant 0 : index
    %c0_0 = arith.constant 0 : index
    %0 = vector.load %arg1[%c0, %c0_0] : memref<64x128xf32, #tpu.memory_space<vmem>>, vector<64x128xf32>
    %1 = tpu.iota {dimensions = array<i32: 1>} : vector<4x16x256xi32>
    %2 = vector.shape_cast %1 : vector<4x16x256xi32> to vector<64x256xi32>
    %c0_i32 = arith.constant 0 : i32
    %3 = vector.broadcast %c0_i32 : i32 to vector<64x256xi32>
    %4 = arith.cmpi sgt, %2, %3 : vector<64x256xi32>
    %5 = arith.extui %4 : vector<64x256xi1> to vector<64x256xi32>
    %6 = arith.sitofp %5 : vector<64x256xi32> to vector<64x256xf32>
    %c15_i32 = arith.constant 15 : i32
    %7 = vector.broadcast %c15_i32 : i32 to vector<64x256xi32>
    %8 = arith.cmpi slt, %2, %7 : vector<64x256xi32>
    %9 = arith.extui %8 : vector<64x256xi1> to vector<64x256xi32>
    %10 = arith.sitofp %9 : vector<64x256xi32> to vector<64x256xf32>
    %c0_1 = arith.constant 0 : index
    %c0_2 = arith.constant 0 : index
    %c0_3 = arith.constant 0 : index
    %11 = vector.load %arg2[%c0_1, %c0_2, %c0_3] : memref<3x128x256xf32, #tpu.memory_space<vmem>>, vector<1x128x256xf32>
    %12 = vector.shape_cast %11 : vector<1x128x256xf32> to vector<128x256xf32>
    %cst = arith.constant dense<0.000000e+00> : vector<64x256xf32>
    %13 = tpu.matmul %0, %12, %cst {dimension_numbers = #tpu.dot_dimension_numbers<[1], [0], [0], [1], [0, 0, 1, 1], [], []>} : vector<64x128xf32>, vector<128x256xf32>, vector<64x256xf32> -> vector<64x256xf32>
    %c1 = arith.constant 1 : index
    %c0_4 = arith.constant 0 : index
    %c0_5 = arith.constant 0 : index
    %14 = vector.load %arg2[%c1, %c0_4, %c0_5] : memref<3x128x256xf32, #tpu.memory_space<vmem>>, vector<1x128x256xf32>
    %15 = vector.shape_cast %14 : vector<1x128x256xf32> to vector<128x256xf32>
    %cst_6 = arith.constant dense<0.000000e+00> : vector<64x256xf32>
    %16 = tpu.matmul %0, %15, %cst_6 {dimension_numbers = #tpu.dot_dimension_numbers<[1], [0], [0], [1], [0, 0, 1, 1], [], []>} : vector<64x128xf32>, vector<128x256xf32>, vector<64x256xf32> -> vector<64x256xf32>
    %c2 = arith.constant 2 : index
    %c0_7 = arith.constant 0 : index
    %c0_8 = arith.constant 0 : index
    %17 = vector.load %arg2[%c2, %c0_7, %c0_8] : memref<3x128x256xf32, #tpu.memory_space<vmem>>, vector<1x128x256xf32>
    %18 = vector.shape_cast %17 : vector<1x128x256xf32> to vector<128x256xf32>
    %cst_9 = arith.constant dense<0.000000e+00> : vector<64x256xf32>
    %19 = tpu.matmul %0, %18, %cst_9 {dimension_numbers = #tpu.dot_dimension_numbers<[1], [0], [0], [1], [0, 0, 1, 1], [], []>} : vector<64x128xf32>, vector<128x256xf32>, vector<64x256xf32> -> vector<64x256xf32>
    %c1_i32 = arith.constant 1 : i32
    %20 = tpu.dynamic_rotate %13 by %c1_i32 dim 0 : vector<64x256xf32>, i32 -> vector<64x256xf32>
    %21 = arith.mulf %20, %6 : vector<64x256xf32>
    %c63_i32 = arith.constant 63 : i32
    %22 = tpu.dynamic_rotate %19 by %c63_i32 dim 0 : vector<64x256xf32>, i32 -> vector<64x256xf32>
    %23 = arith.mulf %22, %10 : vector<64x256xf32>
    %24 = arith.addf %16, %21 : vector<64x256xf32>
    %25 = arith.addf %24, %23 : vector<64x256xf32>
    %26 = vector.extract_strided_slice %25 {offsets = [0, 0], sizes = [64, 128], strides = [1, 1]} : vector<64x256xf32> to vector<64x128xf32>
    %c0_10 = arith.constant 0 : index
    %c0_11 = arith.constant 0 : index
    %27 = vector.load %arg3[%c0_10, %c0_11] : memref<1x128xf32, #tpu.memory_space<vmem>>, vector<1x128xf32>
    %28 = vector.broadcast %27 : vector<1x128xf32> to vector<64x128xf32>
    %29 = arith.addf %26, %28 : vector<64x128xf32>
    %30 = vector.extract_strided_slice %25 {offsets = [0, 128], sizes = [64, 128], strides = [1, 1]} : vector<64x256xf32> to vector<64x128xf32>
    %cst_12 = arith.constant 0.000000e+00 : f32
    %31 = vector.broadcast %cst_12 : f32 to vector<64x128xf32>
    %32 = arith.cmpf ogt, %29, %31 : vector<64x128xf32>
    %cst_13 = arith.constant 1.000000e+00 : f32
    %cst_14 = arith.constant -1.000000e+00 : f32
    %33 = vector.broadcast %cst_13 : f32 to vector<64x128xf32>
    %34 = vector.broadcast %cst_14 : f32 to vector<64x128xf32>
    %35 = arith.select %32, %33, %34 : vector<64x128xi1>, vector<64x128xf32>
    %36 = arith.truncf %35 : vector<64x128xf32> to vector<64x128xbf16>
    %37 = vector.extract_strided_slice %6 {offsets = [0, 0], sizes = [64, 128], strides = [1, 1]} : vector<64x256xf32> to vector<64x128xf32>
    %38 = vector.extract_strided_slice %10 {offsets = [0, 0], sizes = [64, 128], strides = [1, 1]} : vector<64x256xf32> to vector<64x128xf32>
    %c0_15 = arith.constant 0 : index
    %c0_16 = arith.constant 0 : index
    %c0_17 = arith.constant 0 : index
    %39 = vector.load %arg4[%c0_15, %c0_16, %c0_17] : memref<3x128x128xbf16, #tpu.memory_space<vmem>>, vector<1x128x128xbf16>
    %40 = vector.shape_cast %39 : vector<1x128x128xbf16> to vector<128x128xbf16>
    %cst_18 = arith.constant dense<0.000000e+00> : vector<64x128xf32>
    %41 = tpu.matmul %36, %40, %cst_18 {dimension_numbers = #tpu.dot_dimension_numbers<[1], [0], [0], [1], [0, 0, 1, 1], [], []>} : vector<64x128xbf16>, vector<128x128xbf16>, vector<64x128xf32> -> vector<64x128xf32>
    %c1_19 = arith.constant 1 : index
    %c0_20 = arith.constant 0 : index
    %c0_21 = arith.constant 0 : index
    %42 = vector.load %arg4[%c1_19, %c0_20, %c0_21] : memref<3x128x128xbf16, #tpu.memory_space<vmem>>, vector<1x128x128xbf16>
    %43 = vector.shape_cast %42 : vector<1x128x128xbf16> to vector<128x128xbf16>
    %cst_22 = arith.constant dense<0.000000e+00> : vector<64x128xf32>
    %44 = tpu.matmul %36, %43, %cst_22 {dimension_numbers = #tpu.dot_dimension_numbers<[1], [0], [0], [1], [0, 0, 1, 1], [], []>} : vector<64x128xbf16>, vector<128x128xbf16>, vector<64x128xf32> -> vector<64x128xf32>
    %c2_23 = arith.constant 2 : index
    %c0_24 = arith.constant 0 : index
    %c0_25 = arith.constant 0 : index
    %45 = vector.load %arg4[%c2_23, %c0_24, %c0_25] : memref<3x128x128xbf16, #tpu.memory_space<vmem>>, vector<1x128x128xbf16>
    %46 = vector.shape_cast %45 : vector<1x128x128xbf16> to vector<128x128xbf16>
    %cst_26 = arith.constant dense<0.000000e+00> : vector<64x128xf32>
    %47 = tpu.matmul %36, %46, %cst_26 {dimension_numbers = #tpu.dot_dimension_numbers<[1], [0], [0], [1], [0, 0, 1, 1], [], []>} : vector<64x128xbf16>, vector<128x128xbf16>, vector<64x128xf32> -> vector<64x128xf32>
    %c1_i32_27 = arith.constant 1 : i32
    %48 = tpu.dynamic_rotate %41 by %c1_i32_27 dim 0 : vector<64x128xf32>, i32 -> vector<64x128xf32>
    %49 = arith.mulf %48, %37 : vector<64x128xf32>
    %c63_i32_28 = arith.constant 63 : i32
    %50 = tpu.dynamic_rotate %47 by %c63_i32_28 dim 0 : vector<64x128xf32>, i32 -> vector<64x128xf32>
    %51 = arith.mulf %50, %38 : vector<64x128xf32>
    %52 = arith.addf %44, %49 : vector<64x128xf32>
    %53 = arith.addf %52, %51 : vector<64x128xf32>
    %c0_29 = arith.constant 0 : index
    %c0_30 = arith.constant 0 : index
    %54 = vector.load %arg5[%c0_29, %c0_30] : memref<1x128xf32, #tpu.memory_space<vmem>>, vector<1x128xf32>
    %55 = vector.broadcast %54 : vector<1x128xf32> to vector<64x128xf32>
    %56 = arith.mulf %53, %55 : vector<64x128xf32>
    %c0_31 = arith.constant 0 : index
    %c0_32 = arith.constant 0 : index
    %57 = vector.load %arg6[%c0_31, %c0_32] : memref<1x128xf32, #tpu.memory_space<vmem>>, vector<1x128xf32>
    %58 = vector.broadcast %57 : vector<1x128xf32> to vector<64x128xf32>
    %59 = arith.addf %30, %58 : vector<64x128xf32>
    %60 = arith.addf %56, %59 : vector<64x128xf32>
    %cst_33 = arith.constant 0.000000e+00 : f32
    %61 = vector.broadcast %cst_33 : f32 to vector<64x128xf32>
    %62 = arith.cmpf ogt, %60, %61 : vector<64x128xf32>
    %c0_34 = arith.constant 0 : index
    %c0_35 = arith.constant 0 : index
    %63 = vector.load %arg7[%c0_34, %c0_35] : memref<1x128xf32, #tpu.memory_space<vmem>>, vector<1x128xf32>
    %64 = vector.broadcast %63 : vector<1x128xf32> to vector<64x128xf32>
    %65 = arith.mulf %64, %60 : vector<64x128xf32>
    %66 = arith.select %62, %60, %65 : vector<64x128xi1>, vector<64x128xf32>
    %67 = arith.addf %66, %0 : vector<64x128xf32>
    %c0_36 = arith.constant 0 : index
    %c0_37 = arith.constant 0 : index
    %68 = vector.load %arg8[%c0_36, %c0_37] : memref<64x128xf32, #tpu.memory_space<vmem>>, vector<64x128xf32>
    tpu.vector_store %arg8[%c0_36, %c0_37], %67 {strides = array<i32>} : memref<64x128xf32, #tpu.memory_space<vmem>>, vector<64x128xf32>,
    return
  }
  func.func @transform_0(%arg0: i32) -> (i32, i32) {
    %c0_i32 = arith.constant 0 : i32
    %c0_i32_0 = arith.constant 0 : i32
    return %arg0, %c0_i32 : i32, i32
  }
  func.func @transform_1(%arg0: i32) -> (i32, i32, i32) {
    %c0_i32 = arith.constant 0 : i32
    %c0_i32_0 = arith.constant 0 : i32
    %c0_i32_1 = arith.constant 0 : i32
    %c0_i32_2 = arith.constant 0 : i32
    return %c0_i32, %c0_i32_0, %c0_i32_1 : i32, i32, i32
  }
  func.func @transform_2(%arg0: i32) -> (i32, i32) {
    %c0_i32 = arith.constant 0 : i32
    %c0_i32_0 = arith.constant 0 : i32
    %c0_i32_1 = arith.constant 0 : i32
    return %c0_i32, %c0_i32_0 : i32, i32
  }
  func.func @transform_3(%arg0: i32) -> (i32, i32, i32) {
    %c0_i32 = arith.constant 0 : i32
    %c0_i32_0 = arith.constant 0 : i32
    %c0_i32_1 = arith.constant 0 : i32
    %c0_i32_2 = arith.constant 0 : i32
    return %c0_i32, %c0_i32_0, %c0_i32_1 : i32, i32, i32
  }
  func.func @transform_4(%arg0: i32) -> (i32, i32) {
    %c0_i32 = arith.constant 0 : i32
    %c0_i32_0 = arith.constant 0 : i32
    %c0_i32_1 = arith.constant 0 : i32
    return %c0_i32, %c0_i32_0 : i32, i32
  }
  func.func @transform_5(%arg0: i32) -> (i32, i32) {
    %c0_i32 = arith.constant 0 : i32
    %c0_i32_0 = arith.constant 0 : i32
    %c0_i32_1 = arith.constant 0 : i32
    return %c0_i32, %c0_i32_0 : i32, i32
  }
  func.func @transform_6(%arg0: i32) -> (i32, i32) {
    %c0_i32 = arith.constant 0 : i32
    %c0_i32_0 = arith.constant 0 : i32
    %c0_i32_1 = arith.constant 0 : i32
    return %c0_i32, %c0_i32_0 : i32, i32
  }
  func.func @transform_7(%arg0: i32) -> (i32, i32) {
    %c0_i32 = arith.constant 0 : i32
    %c0_i32_0 = arith.constant 0 : i32
    return %arg0, %c0_i32 : i32, i32
  }
}

</mosaic_0001>

<bundles_post_ra>
// kernel: conv_block_pallas.1
= control target key start
LH: loop header
LB: loop body
LE: loop exit
PB: predicated region body
PF: predicated region fallthrough
CT: control target
= control target key end

     0   :  { %s1586_s24 = smov 0   ;;  %s2377_s0 = inlined_call_operand.vmem [shape: f32[128,128], index: 0, kind: input, shape index: {}]   ;;  %s2378_s1 = inlined_call_operand.vmem [shape: f32[3,128,256], index: 1, kind: input, shape index: {}]   ;;  %s2379_s2 = inlined_call_operand.vmem [shape: f32[1,128], index: 2, kind: input, shape index: {}]   ;;  %s2380_s3 = inlined_call_operand.vmem [shape: bf16[3,128,128], index: 3, kind: input, shape index: {}]   ;;  %s2381_s4 = inlined_call_operand.vmem [shape: f32[1,128], index: 4, kind: input, shape index: {}]   ;;  %s2382_s5 = inlined_call_operand.vmem [shape: f32[1,128], index: 5, kind: input, shape index: {}]   ;;  %s2383_s6 = inlined_call_operand.vmem [shape: f32[1,128], index: 6, kind: input, shape index: {}]   ;;  %s2384_s7 = inlined_call_operand.vmem [shape: f32[128,128], index: 7, kind: output, shape index: {}]  }
   0x1 LB: > { %s1264_s25 = sadd.s32 4294967295, %s1542_s24   ;;  %p1268_p0 = scmp.ge.s32.totalorder %s1542_s24, 1  ;;  %s1542_s24 = sphi %s1586_s24, %s17_s24  }
   0x2   : > { %p238_p1 = scmp.lt.s32.totalorder %s1542_s24, 3 }
   0x4   : > { %p239_p2 = pnand %p1268_p0, %p238_p1 }
   0x5   : > { %s1269_s12 = sshll.u32 (!%p239_p2), %s1264_s25, 3 }
   0x6   : > { %242 = sbr.rel (%p239_p2) target bundleno = 439 (0x1b7), region = 48  ;;  %p271_p3 = scmp.lt.s32.totalorder (!%p239_p2), %s1269_s12, 15 }
   0xb   : > { %v335_v0 = vld [vmem:[%s2378_s1 + $0xf0] sm:$0xff]  ;;  %v333_v2 = vld [vmem:[%s2378_s1 + $0xe0] sm:$0xff]  ;;  %s2386_s12 = smov (!%p271_p3, %s1269_s12), 15  ;;  %v336_v35 = vld [vmem:[%s2378_s1 + $0xf8] sm:$0xff] }
   0xc   : > { %v1337_v1 = vld [vmem:[%s2378_s1 + $0x2f0] sm:$0xff]  ;;  %337 = vmatpush.msra.mxu0 %v335_v0  ;;  %1493 = vmatpush.msra.mxu1 %v335_v0  ;;  %v1335_v3 = vld [vmem:[%s2378_s1 + $0x2e0] sm:$0xff]  ;;  %s1270_s14 = sshll.u32 %s2386_s12, 3  ;;  %v334_v37 = vld [vmem:[%s2378_s1 + $0xe8] sm:$0xff] }
   0xd   : > { %485 = vmatpush.msra.mxu2 %v1337_v1  ;;  %v331_v4 = vld [vmem:[%s2378_s1 + $0xd0] sm:$0xff]  ;;  %v329_v6 = vld [vmem:[%s2378_s1 + $0xc0] sm:$0xff]  ;;  %s1691_s22 = scalar_lea.vmem %s2377_s0, %s1270_s14  ;;  %v332_v39 = vld [vmem:[%s2378_s1 + $0xd8] sm:$0xff]  ;;  %s2281_s27 = scalar_lea.vmem %s2384_s7, %s1270_s14 }
   0xe   : > { %338 = vmatpush.msra.mxu0 %v333_v2  ;;  %1494 = vmatpush.msra.mxu1 %v333_v2  ;;  %v1333_v5 = vld [vmem:[%s2378_s1 + $0x2d0] sm:$0xff]  ;;  %v1331_v7 = vld [vmem:[%s2378_s1 + $0x2c0] sm:$0xff]  ;;  %v1338_v40 = vld [vmem:[%s2378_s1 + $0x2f8] sm:$0xff] }
   0xf   : > { %486 = vmatpush.msra.mxu2 %v1335_v3  ;;  %v327_v8 = vld [vmem:[%s2378_s1 + $0xb0] sm:$0xff]  ;;  %v325_v10 = vld [vmem:[%s2378_s1 + $0xa0] sm:$0xff]  ;;  %v330_v42 = vld [vmem:[%s2378_s1 + $0xc8] sm:$0xff]  ;;  %526 = vmatpush.msra.mxu3 %v1338_v40 }
  0x10   : > { %339 = vmatpush.msra.mxu0 %v331_v4  ;;  %1495 = vmatpush.msra.mxu1 %v331_v4  ;;  %v1329_v9 = vld [vmem:[%s2378_s1 + $0x2b0] sm:$0xff]  ;;  %v1327_v11 = vld [vmem:[%s2378_s1 + $0x2a0] sm:$0xff]  ;;  %v1739_v43 = vld [vmem:[%s1691_s22 + $0x8] sm:$0xff] }
  0x11   : > { %487 = vmatpush.msra.mxu2 %v1333_v5  ;;  %v323_v12 = vld [vmem:[%s2378_s1 + $0x90] sm:$0xff]  ;;  %v321_v14 = vld [vmem:[%s2378_s1 + $0x80] sm:$0xff]  ;;  %v1742_v44 = vld [vmem:[%s1691_s22 + $0x28] sm:$0xff] }
  0x12   : > { %340 = vmatpush.msra.mxu0 %v329_v6  ;;  %1496 = vmatpush.msra.mxu1 %v329_v6  ;;  %v1325_v13 = vld [vmem:[%s2378_s1 + $0x290] sm:$0xff]  ;;  %v1323_v15 = vld [vmem:[%s2378_s1 + $0x280] sm:$0xff]  ;;  %v328_v46 = vld [vmem:[%s2378_s1 + $0xb8] sm:$0xff] }
  0x13   : > { %488 = vmatpush.msra.mxu2 %v1331_v7  ;;  %v319_v16 = vld [vmem:[%s2378_s1 + $0x70] sm:$0xff]  ;;  %v317_v18 = vld [vmem:[%s2378_s1 + $0x60] sm:$0xff]  ;;  %v326_v48 = vld [vmem:[%s2378_s1 + $0xa8] sm:$0xff] }
  0x14   : > { %341 = vmatpush.msra.mxu0 %v327_v8  ;;  %1497 = vmatpush.msra.mxu1 %v327_v8  ;;  %v1321_v17 = vld [vmem:[%s2378_s1 + $0x270] sm:$0xff]  ;;  %v1319_v19 = vld [vmem:[%s2378_s1 + $0x260] sm:$0xff]  ;;  %v1336_v49 = vld [vmem:[%s2378_s1 + $0x2e8] sm:$0xff] }
  0x15   : > { %489 = vmatpush.msra.mxu2 %v1329_v9  ;;  %v315_v20 = vld [vmem:[%s2378_s1 + $0x50] sm:$0xff]  ;;  %v313_v22 = vld [vmem:[%s2378_s1 + $0x40] sm:$0xff]  ;;  %527 = vmatpush.msra.mxu3 %v1336_v49  ;;  %v1334_v51 = vld [vmem:[%s2378_s1 + $0x2d8] sm:$0xff] }
  0x16   : > { %342 = vmatpush.msra.mxu0 %v325_v10  ;;  %1498 = vmatpush.msra.mxu1 %v325_v10  ;;  %v1317_v21 = vld [vmem:[%s2378_s1 + $0x250] sm:$0xff]  ;;  %v1315_v23 = vld [vmem:[%s2378_s1 + $0x240] sm:$0xff]  ;;  %v324_v52 = vld [vmem:[%s2378_s1 + $0x98] sm:$0xff] }
  0x17   : > { %490 = vmatpush.msra.mxu2 %v1327_v11  ;;  %v311_v24 = vld [vmem:[%s2378_s1 + $0x30] sm:$0xff]  ;;  %v309_v26 = vld [vmem:[%s2378_s1 + $0x20] sm:$0xff]  ;;  %v1332_v53 = vld [vmem:[%s2378_s1 + $0x2c8] sm:$0xff]  ;;  %528 = vmatpush.msra.mxu3 %v1334_v51 }
  0x18   : > { %343 = vmatpush.msra.mxu0 %v323_v12  ;;  %1499 = vmatpush.msra.mxu1 %v323_v12  ;;  %v1313_v25 = vld [vmem:[%s2378_s1 + $0x230] sm:$0xff]  ;;  %v1311_v27 = vld [vmem:[%s2378_s1 + $0x220] sm:$0xff]  ;;  %v322_v55 = vld [vmem:[%s2378_s1 + $0x88] sm:$0xff] }
  0x19   : > { %491 = vmatpush.msra.mxu2 %v1325_v13  ;;  %v307_v28 = vld [vmem:[%s2378_s1 + $0x10] sm:$0xff]  ;;  %v305_v30 = vld [vmem:[%s2378_s1] sm:$0xff]  ;;  %529 = vmatpush.msra.mxu3 %v1332_v53  ;;  %v320_v59 = vld [vmem:[%s2378_s1 + $0x78] sm:$0xff] }
  0x1a   : > { %344 = vmatpush.msra.mxu0 %v321_v14  ;;  %1500 = vmatpush.msra.mxu1 %v321_v14  ;;  %v1309_v29 = vld [vmem:[%s2378_s1 + $0x210] sm:$0xff]  ;;  %v1307_v31 = vld [vmem:[%s2378_s1 + $0x200] sm:$0xff]  ;;  %v1330_v60 = vld [vmem:[%s2378_s1 + $0x2b8] sm:$0xff] }
  0x1b   : > { %492 = vmatpush.msra.mxu2 %v1323_v15  ;;  %v1703_v32 = vld [vmem:[%s1691_s22] sm:$0xff]  ;;  %v1305_v34 = vld [vmem:[%s2378_s1 + $0x1f0] sm:$0xff]  ;;  %v318_v62 = vld [vmem:[%s2378_s1 + $0x68] sm:$0xff]  ;;  %530 = vmatpush.msra.mxu3 %v1330_v60 }
  0x1c   : > { %345 = vmatpush.msra.mxu0 %v319_v16  ;;  %1501 = vmatpush.msra.mxu1 %v319_v16  ;;  %v1706_v33 = vld [vmem:[%s1691_s22 + $0x20] sm:$0xff]  ;;  %v1301_v38 = vld [vmem:[%s2378_s1 + $0x1d0] sm:$0xff]  ;;  %v1328_v63 = vld [vmem:[%s2378_s1 + $0x2a8] sm:$0xff] }
  0x1d   : > { %493 = vmatpush.msra.mxu2 %v1321_v17  ;;  %v1303_v36 = vld [vmem:[%s2378_s1 + $0x1e0] sm:$0xff]  ;;  %v1297_v45 = vld [vmem:[%s2378_s1 + $0x1b0] sm:$0xff]  ;;  %v316_v1 = vld [vmem:[%s2378_s1 + $0x58] sm:$0xff]  ;;  %531 = vmatpush.msra.mxu3 %v1328_v63 }
  0x1e   : > { %346 = vmatpush.msra.mxu0 %v317_v18  ;;  %1502 = vmatpush.msra.mxu1 %v317_v18  ;;  %v1299_v41 = vld [vmem:[%s2378_s1 + $0x1c0] sm:$0xff]  ;;  %v1293_v50 = vld [vmem:[%s2378_s1 + $0x190] sm:$0xff]  ;;  %v1326_v2 = vld [vmem:[%s2378_s1 + $0x298] sm:$0xff] }
  0x1f   : > { %494 = vmatpush.msra.mxu2 %v1319_v19  ;;  %v1295_v47 = vld [vmem:[%s2378_s1 + $0x1a0] sm:$0xff]  ;;  %v1781_v56 = vld [vmem:[%s1691_s22 + $0x10] sm:$0xff]  ;;  %v314_v4 = vld [vmem:[%s2378_s1 + $0x48] sm:$0xff]  ;;  %532 = vmatpush.msra.mxu3 %v1326_v2 }
  0x20   : > { %347 = vmatpush.msra.mxu0 %v315_v20  ;;  %1503 = vmatpush.msra.mxu1 %v315_v20  ;;  %v1291_v54 = vld [vmem:[%s2378_s1 + $0x180] sm:$0xff]  ;;  %v1784_v57 = vld [vmem:[%s1691_s22 + $0x30] sm:$0xff]  ;;  %v1823_v5 = vld [vmem:[%s1691_s22 + $0x18] sm:$0xff] }
  0x21   : > { %495 = vmatpush.msra.mxu2 %v1317_v21  ;;  %v1289_v58 = vld [vmem:[%s2378_s1 + $0x170] sm:$0xff]  ;;  %v1287_v61 = vld [vmem:[%s2378_s1 + $0x160] sm:$0xff]  ;;  %v1826_v6 = vld [vmem:[%s1691_s22 + $0x38] sm:$0xff] }
  0x22   : > { %348 = vmatpush.msra.mxu0 %v313_v22  ;;  %1504 = vmatpush.msra.mxu1 %v313_v22  ;;  %v1285_v0 = vld [vmem:[%s2378_s1 + $0x150] sm:$0xff]  ;;  %v1283_v3 = vld [vmem:[%s2378_s1 + $0x140] sm:$0xff]  ;;  %v312_v8 = vld [vmem:[%s2378_s1 + $0x38] sm:$0xff] }
  0x23   : > { %496 = vmatpush.msra.mxu2 %v1315_v23  ;;  %v1281_v7 = vld [vmem:[%s2378_s1 + $0x130] sm:$0xff]  ;;  %v1324_v9 = vld [vmem:[%s2378_s1 + $0x288] sm:$0xff]  ;;  %v1279_v10 = vld [vmem:[%s2378_s1 + $0x120] sm:$0xff] }
  0x24   : > { %349 = vmatpush.msra.mxu0 %v311_v24  ;;  %1505 = vmatpush.msra.mxu1 %v311_v24  ;;  %v310_v11 = vld [vmem:[%s2378_s1 + $0x28] sm:$0xff]  ;;  %v1322_v12 = vld [vmem:[%s2378_s1 + $0x278] sm:$0xff]  ;;  %v1277_v13 = vld [vmem:[%s2378_s1 + $0x110] sm:$0xff] }
  0x25   : > { %497 = vmatpush.msra.mxu2 %v1313_v25  ;;  %533 = vmatpush.msra.mxu3 %v1324_v9  ;;  %v308_v14 = vld [vmem:[%s2378_s1 + $0x18] sm:$0xff]  ;;  %v1320_v15 = vld [vmem:[%s2378_s1 + $0x268] sm:$0xff]  ;;  %v1275_v16 = vld [vmem:[%s2378_s1 + $0x100] sm:$0xff] }
  0x26   : > { %350 = vmatpush.msra.mxu0 %v309_v26  ;;  %1506 = vmatpush.msra.mxu1 %v309_v26  ;;  %v306_v17 = vld [vmem:[%s2378_s1 + $0x8] sm:$0xff]  ;;  %v1318_v18 = vld [vmem:[%s2378_s1 + $0x258] sm:$0xff]  ;;  %v1473_v49 = vld [vmem:[%s2380_s3 + $0x20] sm:$0xff] }
  0x27   : > { %498 = vmatpush.msra.mxu2 %v1311_v27  ;;  %534 = vmatpush.msra.mxu3 %v1322_v12  ;;  %v1316_v19 = vld [vmem:[%s2378_s1 + $0x248] sm:$0xff]  ;;  %v1306_v20 = vld [vmem:[%s2378_s1 + $0x1f8] sm:$0xff]  ;;  %v1489_v53 = vld [vmem:[%s2380_s3 + $0xa0] sm:$0xff] }
  0x28   : > { %351 = vmatpush.msra.mxu0 %v307_v28  ;;  %1507 = vmatpush.msra.mxu1 %v307_v28  ;;  %v1304_v21 = vld [vmem:[%s2378_s1 + $0x1e8] sm:$0xff]  ;;  %v1314_v22 = vld [vmem:[%s2378_s1 + $0x238] sm:$0xff]  ;;  %v1481_v60 = vld [vmem:[%s2380_s3 + $0x60] sm:$0xff] }
  0x29   : > { %499 = vmatpush.msra.mxu2 %v1309_v29  ;;  %535 = vmatpush.msra.mxu3 %v1320_v15  ;;  %v1302_v23 = vld [vmem:[%s2378_s1 + $0x1d8] sm:$0xff]  ;;  %v1312_v24 = vld [vmem:[%s2378_s1 + $0x228] sm:$0xff]  ;;  %v1477_v12 = vld [vmem:[%s2380_s3 + $0x40] sm:$0xff] }
  0x2a   : > { %352 = vmatpush.msra.mxu0 %v305_v30  ;;  %1508 = vmatpush.msra.mxu1 %v305_v30  ;;  %v1310_v25 = vld [vmem:[%s2378_s1 + $0x218] sm:$0xff]  ;;  %v1300_v26 = vld [vmem:[%s2378_s1 + $0x1c8] sm:$0xff] }
  0x2b   : > { %500 = vmatpush.msra.mxu2 %v1307_v31  ;;  %353 = vmatmul.f32.vlgmr.msra.gmra.mxu0 %v1703_v32  ;;  %v1308_v27 = vld [vmem:[%s2378_s1 + $0x208] sm:$0xff]  ;;  %v1298_v28 = vld [vmem:[%s2378_s1 + $0x1b8] sm:$0xff] }
  0x2c   : > { %365 = vmatmul.f32.vlgmr.msra.gmra.mxu1 %v1706_v33  ;;  %501 = vmatmul.f32.vlgmr.msra.gmra.mxu2 %v1703_v32  ;;  %v1296_v29 = vld [vmem:[%s2378_s1 + $0x1a8] sm:$0xff]  ;;  %v1294_v30 = vld [vmem:[%s2378_s1 + $0x198] sm:$0xff] }
  0x2d   : > { %665 = vmatpush.msrb.mxu0 %v1305_v34  ;;  %378 = vmatpush.msrb.mxu1 %v336_v35  ;;  %v1292_v31 = vld [vmem:[%s2378_s1 + $0x188] sm:$0xff]  ;;  %v1290_v34 = vld [vmem:[%s2378_s1 + $0x178] sm:$0xff] }
  0x2e   : > { %536 = vmatpush.msra.mxu3 %v1318_v18  ;;  %v1288_v35 = vld [vmem:[%s2378_s1 + $0x168] sm:$0xff]  ;;  %v1278_v40 = vld [vmem:[%s2378_s1 + $0x118] sm:$0xff] }
  0x2f   : > { %666 = vmatpush.msrb.mxu0 %v1303_v36  ;;  %379 = vmatpush.msrb.mxu1 %v334_v37  ;;  %v1286_v36 = vld [vmem:[%s2378_s1 + $0x158] sm:$0xff]  ;;  %v1284_v37 = vld [vmem:[%s2378_s1 + $0x148] sm:$0xff] }
  0x30   : > { %537 = vmatpush.msra.mxu3 %v1316_v19  ;;  %v1472_v51 = vld [vmem:[%s2380_s3 + $0x18] sm:$0xff]  ;;  %v1470_v2 = vld [vmem:[%s2380_s3 + $0x8] sm:$0xff] }
  0x31   : > { %667 = vmatpush.msrb.mxu0 %v1301_v38  ;;  %380 = vmatpush.msrb.mxu1 %v332_v39  ;;  %v1282_v38 = vld [vmem:[%s2378_s1 + $0x138] sm:$0xff]  ;;  %v1280_v39 = vld [vmem:[%s2378_s1 + $0x128] sm:$0xff] }
  0x32   : > { %538 = vmatpush.msra.mxu3 %v1314_v22 }
  0x33   : > { %668 = vmatpush.msrb.mxu0 %v1299_v41  ;;  %381 = vmatpush.msrb.mxu1 %v330_v42  ;;  %v1276_v41 = vld [vmem:[%s2378_s1 + $0x108] sm:$0xff]  ;;  %v1476_v42 = vld [vmem:[%s2380_s3 + $0x38] sm:$0xff] }
  0x34   : > { %356 = vmatmul.f32.gmra.mxu0 %v1739_v43  ;;  %368 = vmatmul.f32.gmra.mxu1 %v1742_v44 }
  0x35   : > { %504 = vmatmul.f32.gmra.mxu2 %v1739_v43  ;;  %669 = vmatpush.msrb.mxu0 %v1297_v45  ;;  %v1475_v45 = vld [vmem:[%s2380_s3 + $0x30] sm:$0xff] }
  0x36   : > { %382 = vmatpush.msrb.mxu1 %v328_v46  ;;  %539 = vmatpush.msra.mxu3 %v1312_v24  ;;  %v1492_v46 = vld [vmem:[%s2380_s3 + $0xb8] sm:$0xff] }
  0x37   : > { %670 = vmatpush.msrb.mxu0 %v1295_v47  ;;  %859 = vmatpush.bf16.msrb.mxu2 %v1476_v42  ;;  %v1474_v47 = vld [vmem:[%s2380_s3 + $0x28] sm:$0xff] }
  0x38   : > { %383 = vmatpush.msrb.mxu1 %v326_v48  ;;  %540 = vmatpush.msra.mxu3 %v1310_v25  ;;  %v1491_v48 = vld [vmem:[%s2380_s3 + $0xb0] sm:$0xff] }
  0x39   : > { %671 = vmatpush.msrb.mxu0 %v1293_v50  ;;  %v1484_v50 = vld [vmem:[%s2380_s3 + $0x78] sm:$0xff] }
  0x3a   : > { %384 = vmatpush.msrb.mxu1 %v324_v52  ;;  %541 = vmatpush.msra.mxu3 %v1308_v27  ;;  %v1483_v52 = vld [vmem:[%s2380_s3 + $0x70] sm:$0xff] }
  0x3b   : > { %672 = vmatpush.msrb.mxu0 %v1291_v54  ;;  %542 = vmatmul.f32.vlgmr.msra.gmra.mxu3 %v1703_v32  ;;  %v1482_v54 = vld [vmem:[%s2380_s3 + $0x68] sm:$0xff] }
  0x3c   : > { %385 = vmatpush.msrb.mxu1 %v322_v55  ;;  %359 = vmatmul.f32.gmra.mxu0 %v1781_v56  ;;  %v1471_v55 = vld [vmem:[%s2380_s3 + $0x10] sm:$0xff] }
  0x3d   : > { %371 = vmatmul.f32.gmra.mxu1 %v1784_v57  ;;  %507 = vmatmul.f32.gmra.mxu2 %v1781_v56 }
  0x3e   : > { %673 = vmatpush.msrb.mxu0 %v1289_v58  ;;  %386 = vmatpush.msrb.mxu1 %v320_v59 }
  0x3f   : > { %860 = vmatpush.bf16.msrb.mxu2 %v1475_v45  ;;  %970 = vmatpush.bf16.msrb.mxu3 %v1492_v46 }
  0x40   : > { %674 = vmatpush.msrb.mxu0 %v1287_v61  ;;  %387 = vmatpush.msrb.mxu1 %v318_v62  ;;  %v1488_v61 = vld [vmem:[%s2380_s3 + $0x98] sm:$0xff] }
  0x41   : > { %v1480_v62 = vld [vmem:[%s2380_s3 + $0x58] sm:$0xff] }
  0x42   : > { %675 = vmatpush.msrb.mxu0 %v1285_v0  ;;  %388 = vmatpush.msrb.mxu1 %v316_v1 }
  0x43   : > { %545 = vmatmul.f32.gmra.mxu3 %v1739_v43  ;;  %861 = vmatpush.bf16.msrb.mxu2 %v1474_v47 }
  0x44   : > { %676 = vmatpush.msrb.mxu0 %v1283_v3  ;;  %389 = vmatpush.msrb.mxu1 %v314_v4  ;;  %v1487_v3 = vld [vmem:[%s2380_s3 + $0x90] sm:$0xff]  ;;  %v1486_v4 = vld [vmem:[%s2380_s3 + $0x88] sm:$0xff] }
  0x45   : > { %362 = vmatmul.f32.gmra.mxu0 %v1823_v5  ;;  %374 = vmatmul.f32.gmra.mxu1 %v1826_v6 }
  0x46   : > { %510 = vmatmul.f32.gmra.mxu2 %v1823_v5  ;;  %677 = vmatpush.msrb.mxu0 %v1281_v7  ;;  %v1478_v7 = vld [vmem:[%s2380_s3 + $0x48] sm:$0xff] }
  0x47   : > { %390 = vmatpush.msrb.mxu1 %v312_v8  ;;  %971 = vmatpush.bf16.msrb.mxu3 %v1491_v48 }
  0x48   : > { %678 = vmatpush.msrb.mxu0 %v1279_v10  ;;  %862 = vmatpush.bf16.msrb.mxu2 %v1473_v49  ;;  %v1469_v10 = vld [vmem:[%s2380_s3] sm:$0xff] }
  0x49   : > { %391 = vmatpush.msrb.mxu1 %v310_v11  ;;  %v1485_v11 = vld [vmem:[%s2380_s3 + $0x80] sm:$0xff] }
  0x4a   : > { %679 = vmatpush.msrb.mxu0 %v1277_v13 }
  0x4b   : > { %392 = vmatpush.msrb.mxu1 %v308_v14  ;;  %548 = vmatmul.f32.gmra.mxu3 %v1781_v56 }
  0x4c   : > { %680 = vmatpush.msrb.mxu0 %v1275_v16  ;;  %863 = vmatpush.bf16.msrb.mxu2 %v1472_v51 }
  0x4d   : > { %393 = vmatpush.msrb.mxu1 %v306_v17  ;;  %681 = vmatmul.f32.vlgmr.msrb.gmra.mxu0 %v1703_v32 }
  0x4e   : > { %394 = vmatmul.f32.vlgmr.msrb.gmra.mxu1 %v1703_v32  ;;  %513 = vmatmul.f32.gmra.mxu2 %v1706_v33 }
  0x4f   : > { %706 = vmatpush.msra.mxu1 %v1306_v20  ;;  %1095 = vmatpush.bf16.msra.mxu0 %v1484_v50  ;;  %v1544_v20 = vmov 0.0  }
  0x50   : > { %864 = vmatpush.bf16.msrb.mxu2 %v1471_v55 }
  0x51   : > { %707 = vmatpush.msra.mxu1 %v1304_v21 }
  0x53   : > { %708 = vmatpush.msra.mxu1 %v1302_v23  ;;  %551 = vmatmul.f32.gmra.mxu3 %v1823_v5 }
  0x54   : > { %1096 = vmatpush.bf16.msra.mxu0 %v1483_v52  ;;  %865 = vmatpush.bf16.msrb.mxu2 %v1470_v2 }
  0x55   : > { %684 = vmatmul.f32.gmra.mxu0 %v1739_v43  ;;  %709 = vmatpush.msra.mxu1 %v1300_v26 }
  0x56   : > { %397 = vmatmul.f32.gmra.mxu1 %v1739_v43  ;;  %516 = vmatmul.f32.gmra.mxu2 %v1742_v44 }
  0x57   : > { %710 = vmatpush.msra.mxu1 %v1298_v28 }
  0x58   : > { %1097 = vmatpush.bf16.msra.mxu0 %v1482_v54  ;;  %866 = vmatpush.bf16.msrb.mxu2 %v1469_v10 }
  0x59   : > { %711 = vmatpush.msra.mxu1 %v1296_v29 }
  0x5b   : > { %712 = vmatpush.msra.mxu1 %v1294_v30  ;;  %554 = vmatmul.f32.gmra.mxu3 %v1706_v33 }
  0x5c   : > { %1098 = vmatpush.bf16.msra.mxu0 %v1481_v60  ;;  %1509 = vmatpush.bf16.msra.mxu2 %v1484_v50 }
  0x5d   : > { %687 = vmatmul.f32.gmra.mxu0 %v1781_v56  ;;  %713 = vmatpush.msra.mxu1 %v1292_v31 }
  0x5e   : > { %400 = vmatmul.f32.gmra.mxu1 %v1781_v56  ;;  %519 = vmatmul.f32.gmra.mxu2 %v1784_v57 }
  0x5f   : > { %714 = vmatpush.msra.mxu1 %v1290_v34 }
  0x60   : > { %1099 = vmatpush.bf16.msra.mxu0 %v1480_v62  ;;  %1510 = vmatpush.bf16.msra.mxu2 %v1483_v52 }
  0x61   : > { %715 = vmatpush.msra.mxu1 %v1288_v35  ;;  %v2082_v35 = vld [vmem:[%s2379_s2] ss:$0 sm:$0xff] }
  0x63   : > { %716 = vmatpush.msra.mxu1 %v1286_v36  ;;  %557 = vmatmul.f32.gmra.mxu3 %v1742_v44 }
  0x64   : > { %1511 = vmatpush.bf16.msra.mxu2 %v1482_v54 }
  0x65   : > { %690 = vmatmul.f32.gmra.mxu0 %v1823_v5  ;;  %717 = vmatpush.msra.mxu1 %v1284_v37 }
  0x66   : > { %403 = vmatmul.f32.gmra.mxu1 %v1823_v5  ;;  %522 = vmatmul.f32.gmra.mxu2 %v1826_v6 }
  0x67   : > { %718 = vmatpush.msra.mxu1 %v1282_v38 }
  0x68   : > { %1512 = vmatpush.bf16.msra.mxu2 %v1481_v60 }
  0x69   : > { %719 = vmatpush.msra.mxu1 %v1280_v39 }
  0x6b   : > { %720 = vmatpush.msra.mxu1 %v1278_v40  ;;  %560 = vmatmul.f32.gmra.mxu3 %v1784_v57 }
  0x6c   : > { %1513 = vmatpush.bf16.msra.mxu2 %v1480_v62 }
  0x6d   : > { %693 = vmatmul.f32.gmra.mxu0 %v1706_v33  ;;  %721 = vmatpush.msra.mxu1 %v1276_v41 }
  0x6e   : > { %406 = vmatmul.f32.gmra.mxu1 %v1706_v33 }
  0x73   : > { %563 = vmatmul.f32.gmra.mxu3 %v1826_v6 }
  0x75   : > { %696 = vmatmul.f32.gmra.mxu0 %v1742_v44 }
  0x76   : > { %409 = vmatmul.f32.gmra.mxu1 %v1742_v44 }
  0x7d   : > { %699 = vmatmul.f32.gmra.mxu0 %v1784_v57 }
  0x7e   : > { %412 = vmatmul.f32.gmra.mxu1 %v1784_v57 }
  0x85   : > { %702 = vmatmul.f32.gmra.mxu0 %v1826_v6 }
  0x86   : > { %415 = vmatmul.f32.gmra.mxu1 %v1826_v6 }
  0x8e   : > { %722 = vmatmul.f32.vlgmr.msra.gmra.mxu1 %v1703_v32  ;;  %v1490_v32 = vld [vmem:[%s2380_s3 + $0xa8] sm:$0xff] }
  0x8f   : > { %972 = vmatpush.bf16.msrb.mxu3 %v1490_v32 }
  0x93   : > { %973 = vmatpush.bf16.msrb.mxu3 %v1489_v53  ;;  %v1545_v53 = vmov -1.0  }
  0x96   : > { %725 = vmatmul.f32.gmra.mxu1 %v1739_v43 }
  0x97   : > { %974 = vmatpush.bf16.msrb.mxu3 %v1488_v61 }
  0x9b   : > { %975 = vmatpush.bf16.msrb.mxu3 %v1487_v3 }
  0x9e   : > { %728 = vmatmul.f32.gmra.mxu1 %v1781_v56 }
  0x9f   : > { %976 = vmatpush.bf16.msrb.mxu3 %v1486_v4 }
  0xa3   : > { %977 = vmatpush.bf16.msrb.mxu3 %v1485_v11 }
  0xa6   : > { %731 = vmatmul.f32.gmra.mxu1 %v1823_v5 }
  0xa8   : > { %v2001_v58 = vpop.f32.mrf.mxu0 }
  0xa9   : > { %v2003_v59 = vpop.f32.mrf.mxu1  ;;  %v567_v19 = vrot.slane %v2001_v58, 7 }
  0xae   : > { %734 = vmatmul.f32.gmra.mxu1 %v1706_v33  ;;  %v1479_v33 = vld [vmem:[%s2380_s3 + $0x50] sm:$0xff] }
  0xaf   : > { %v2015_v63 = vpop.f32.mrf.mxu2  ;;  %1100 = vmatpush.bf16.msra.mxu0 %v1479_v33  ;;  %1514 = vmatpush.bf16.msra.mxu2 %v1479_v33 }
  0xb0   : > { %v616_v24 = vrot.slane %v2015_v63, 1 }
  0xb1   : > { %v2017_v0 = vpop.f32.mrf.mxu0  ;;  %v2019_v1 = vpop.f32.mrf.mxu1 }
  0xb2   : > { %v569_v30 = vrot.slane %v2017_v0, 7 }
  0xb3   : > { %1101 = vmatpush.bf16.msra.mxu0 %v1478_v7  ;;  %1515 = vmatpush.bf16.msra.mxu2 %v1478_v7 }
  0xb6   : > { %737 = vmatmul.f32.gmra.mxu1 %v1742_v44  ;;  %v290_v44 = vlaneseq }
  0xb7   : > { %1102 = vmatpush.bf16.msra.mxu0 %v1477_v12  ;;  %1516 = vmatpush.bf16.msra.mxu2 %v1477_v12 }
  0xb8   : > { %v505_v8 = vpop.f32.mrf.mxu2  ;;  %v2051_v14 = vshrl.u32 %v290_v44, 7 }
  0xb9   : > { %v2037_v9 = vpop.f32.mrf.mxu0  ;;  %v618_v25 = vrot.slane %v505_v8, 1 }
  0xba   : > { %v2048_v13 = vpop.f32.mrf.mxu1  ;;  %vm293_vm0 = vcmp.gt.s32.totalorder %v2051_v14, 0  ;;  %vm583_vm1 = vcmp.lt.s32.totalorder %v2051_v14, 1  ;;  %v292_v23 = vadd.s32 8, %v2051_v14  ;;  %vm632_vm2 = vcmp.lt.s32.totalorder %v2051_v14, 7 }
  0xbb   : > { %v2066_v21 = vsel %vm293_vm0, 1.0, %v1544_v20  ;;  %v645_v31 = vsel %vm632_vm2, %v616_v24, %v618_v25  ;;  %v571_v38 = vrot.slane %v2037_v9, 7  ;;  %v596_v39 = vsel %vm583_vm1, %v567_v19, %v569_v30 }
  0xbc   : > { %vm300_vm3 = vcmp.lt.s32.totalorder %v292_v23, 15 }
  0xbd   : > { %v2086_v37 = vsel %vm300_vm3, 1.0, %v1544_v20  ;;  %v594_v48 = vsel %vm583_vm1, %v569_v30, %v571_v38 }
  0xbe   : > { %740 = vmatmul.f32.gmra.mxu1 %v1784_v57  ;;  %v604_v50 = vmul.f32 %v2066_v21, %v594_v48  ;;  %v2103_v0 = vpop.f32.mrf.mxu3 }
  0xc0   : > { %v508_v17 = vpop.f32.mrf.mxu2 }
  0xc1   : > { %v620_v28 = vrot.slane %v508_v17, 1 }
  0xc2   : > { %v2053_v15 = vpop.f32.mrf.mxu0  ;;  %v2055_v16 = vpop.f32.mrf.mxu1 }
  0xc3   : > { %v581_v18 = vrot.slane %v2055_v16, 7  ;;  %v643_v36 = vsel %vm632_vm2, %v618_v25, %v620_v28  ;;  %v573_v2 = vrot.slane %v2053_v15, 7  ;;  %v575_v15 = vrot.slane %v2003_v59, 7 }
  0xc4   : > { %v651_v45 = vmul.f32 %v2086_v37, %v643_v36 }
  0xc5   : > { %v598_v57 = vsel %vm583_vm1, %v581_v18, %v567_v19  ;;  %v592_v8 = vsel %vm583_vm1, %v571_v38, %v573_v2  ;;  %v617_v19 = vrot.slane %v2103_v0, 1  ;;  %v590_v20 = vsel %vm583_vm1, %v573_v2, %v575_v15 }
  0xc6   : > { %743 = vmatmul.f32.gmra.mxu1 %v1826_v6  ;;  %v600_v22 = vmul.f32 %v2066_v21, %v598_v57  ;;  %v546_v57 = vpop.f32.mrf.mxu3  ;;  %v608_v25 = vmul.f32 %v2066_v21, %v590_v20 }
  0xc9   : > { %v511_v29 = vpop.f32.mrf.mxu2 }
  0xca   : > { %v682_v26 = vpop.f32.mrf.mxu0  ;;  %v622_v51 = vrot.slane %v511_v29, 1 }
  0xcb   : > { %v2072_v6 = vpop.f32.mrf.mxu1  ;;  %v683_v27 = vadd.f32 %v682_v26, %v600_v22  ;;  %v619_v22 = vrot.slane %v546_v57, 1 }
  0xcc   : > { %v641_v3 = vsel %vm632_vm2, %v620_v28, %v622_v51 }
  0xcd   : > { %v747_v34 = vadd.f32 %v683_v27, %v645_v31  ;;  %v2126_v26 = vsel %vm632_vm2, %v617_v19, %v619_v22 }
  0xcf   : > { %v767_v41 = vadd.f32 %v2082_v35, %v747_v34 }
  0xd1   : > { %vm775_vm4 = vcmp.gt.f32.partialorder %v767_v41, 0.0  ;;  %v514_v49 = vpop.f32.mrf.mxu2 }
  0xd2   : > { %v685_v40 = vpop.f32.mrf.mxu0  ;;  %v783_v54 = vsel %vm775_vm4, 1.0, %v1545_v53  ;;  %v624_v62 = vrot.slane %v514_v49, 1  ;;  %v579_v49 = vrot.slane %v2048_v13, 7 }
  0xd3   : > { %v2092_v42 = vpop.f32.mrf.mxu1  ;;  %v686_v46 = vadd.f32 %v685_v40, %v596_v39  ;;  %v549_v39 = vpop.f32.mrf.mxu3  ;;  %v577_v40 = vrot.slane %v2019_v1, 7 }
  0xd4   : > { %v639_v4 = vsel %vm632_vm2, %v622_v51, %v624_v62 }
  0xd5   : > { %v749_v47 = vadd.f32 %v686_v46, %v651_v45  ;;  %v655_v12 = vmul.f32 %v2086_v37, %v639_v4  ;;  %v621_v45 = vrot.slane %v549_v39, 1 }
  0xd7   : > { %v768_v32 = vadd.f32 %v2082_v35, %v749_v47  ;;  %v2139_v48 = vsel %vm632_vm2, %v619_v22, %v621_v45 }
  0xd9   : > { %vm776_vm5 = vcmp.gt.f32.partialorder %v768_v32, 0.0  ;;  %v517_v7 = vpop.f32.mrf.mxu2  ;;  %v588_v32 = vsel %vm583_vm1, %v575_v15, %v577_v40 }
  0xda   : > { %v688_v52 = vpop.f32.mrf.mxu0  ;;  %v784_v55 = vsel %vm776_vm5, 1.0, %v1545_v53  ;;  %v626_v59 = vrot.slane %v517_v7, 1 }
  0xdb   : > { %v2101_v58 = vpop.f32.mrf.mxu1  ;;  %v689_v60 = vadd.f32 %v688_v52, %v604_v50  ;;  %v791_v61 = vpack.c.bf16 %v784_v55, %v783_v54 }
  0xdc   : > { %v637_v41 = vsel %vm632_vm2, %v624_v62, %v626_v59 }
  0xdd   : > { %867 = vmatmul.bf16.vlgmr.msrb.gmra.mxu2 %v791_v61  ;;  %978 = vmatmul.bf16.vlgmr.msrb.gmra.mxu3 %v791_v61  ;;  %v751_v33 = vadd.f32 %v689_v60, %v641_v3  ;;  %v552_v60 = vpop.f32.mrf.mxu3 }
  0xde   : > { %1103 = vmatmul.bf16.vlgmr.msra.gmra.mxu0 %v791_v61  ;;  %v586_v61 = vsel %vm583_vm1, %v577_v40, %v579_v49  ;;  %v623_v62 = vrot.slane %v552_v60, 1 }
  0xdf   : > { %v769_v10 = vadd.f32 %v2082_v35, %v751_v33  ;;  %v612_v33 = vmul.f32 %v2066_v21, %v586_v61 }
  0xe0   : > { %v2153_v2 = vsel %vm632_vm2, %v621_v45, %v623_v62 }
  0xe1   : > { %vm777_vm6 = vcmp.gt.f32.partialorder %v769_v10, 0.0  ;;  %v520_v30 = vpop.f32.mrf.mxu2 }
  0xe2   : > { %v691_v9 = vpop.f32.mrf.mxu0  ;;  %v785_v28 = vsel %vm777_vm6, 1.0, %v1545_v53  ;;  %v628_v38 = vrot.slane %v520_v30, 1 }
  0xe3   : > { %v2113_v11 = vpop.f32.mrf.mxu1  ;;  %v692_v44 = vadd.f32 %v691_v9, %v592_v8 }
  0xe4   : > { %v635_v47 = vsel %vm632_vm2, %v626_v59, %v628_v38  ;;  %v584_v59 = vsel %vm583_vm1, %v579_v49, %v581_v18  ;;  %v570_v49 = vrot.slane %v2092_v42, 7 }
  0xe5   : > { %v753_v17 = vadd.f32 %v692_v44, %v655_v12  ;;  %v659_v52 = vmul.f32 %v2086_v37, %v635_v47  ;;  %v555_v15 = vpop.f32.mrf.mxu3 }
  0xe6   : > { %v625_v57 = vrot.slane %v555_v15, 1 }
  0xe7   : > { %v770_v23 = vadd.f32 %v2082_v35, %v753_v17 }
  0xe9   : > { %vm778_vm7 = vcmp.gt.f32.partialorder %v770_v23, 0.0  ;;  %v523_v3 = vpop.f32.mrf.mxu2  ;;  %v2168_v23 = vsel %vm632_vm2, %v623_v62, %v625_v57 }
  0xea   : > { %v694_v27 = vpop.f32.mrf.mxu0  ;;  %v786_v29 = vsel %vm778_vm7, 1.0, %v1545_v53  ;;  %v630_v44 = vrot.slane %v523_v3, 1 }
  0xeb   : > { %v2130_v31 = vpop.f32.mrf.mxu1  ;;  %v695_v34 = vadd.f32 %v694_v27, %v608_v25  ;;  %v792_v36 = vpack.c.bf16 %v786_v29, %v785_v28  ;;  %v568_v25 = vrot.slane %v2072_v6, 7 }
  0xec   : > { %v633_v17 = vsel %vm632_vm2, %v628_v38, %v630_v44  ;;  %v647_v22 = vsel %vm632_vm2, %v630_v44, %v616_v24 }
  0xed   : > { %872 = vmatmul.bf16.gmra.mxu2 %v792_v36  ;;  %983 = vmatmul.bf16.gmra.mxu3 %v792_v36  ;;  %v755_v46 = vadd.f32 %v695_v34, %v637_v41  ;;  %v663_v63 = vmul.f32 %v2086_v37, %v647_v22 }
  0xee   : > { %1108 = vmatmul.bf16.gmra.mxu0 %v792_v36  ;;  %v558_v36 = vpop.f32.mrf.mxu3 }
  0xef   : > { %v771_v1 = vadd.f32 %v2082_v35, %v755_v46  ;;  %v627_v39 = vrot.slane %v558_v36, 1 }
  0xf1   : > { %vm779_vm8 = vcmp.gt.f32.partialorder %v771_v1, 0.0  ;;  %v2183_v18 = vsel %vm632_vm2, %v625_v57, %v627_v39 }
  0xf2   : > { %v697_v50 = vpop.f32.mrf.mxu0  ;;  %v787_v7 = vsel %vm779_vm8, 1.0, %v1545_v53 }
  0xf3   : > { %v2145_v51 = vpop.f32.mrf.mxu1  ;;  %v698_v54 = vadd.f32 %v697_v50, %v588_v32 }
  0xf5   : > { %v757_v55 = vadd.f32 %v698_v54, %v659_v52  ;;  %v597_v52 = vsel %vm583_vm1, %v568_v25, %v570_v49 }
  0xf6   : > { %v561_v32 = vpop.f32.mrf.mxu3 }
  0xf7   : > { %v772_v13 = vadd.f32 %v2082_v35, %v757_v55  ;;  %v629_v50 = vrot.slane %v561_v32, 1  ;;  %v2258_v32 = vld [vmem:[%s2382_s5] ss:$0 sm:$0xff] }
  0xf9   : > { %vm780_vm9 = vcmp.gt.f32.partialorder %v772_v13, 0.0  ;;  %v2193_v1 = vsel %vm632_vm2, %v627_v39, %v629_v50 }
  0xfa   : > { %v700_v4 = vpop.f32.mrf.mxu0  ;;  %v788_v8 = vsel %vm780_vm9, 1.0, %v1545_v53 }
  0xfb   : > { %v2158_v9 = vpop.f32.mrf.mxu1  ;;  %v701_v10 = vadd.f32 %v700_v4, %v612_v33  ;;  %v793_v12 = vpack.c.bf16 %v788_v8, %v787_v7 }
  0xfc   : > { %v580_v4 = vrot.slane %v2158_v9, 7 }
  0xfd   : > { %877 = vmatmul.bf16.gmra.mxu2 %v793_v12  ;;  %988 = vmatmul.bf16.gmra.mxu3 %v793_v12  ;;  %v759_v20 = vadd.f32 %v701_v10, %v633_v17 }
  0xfe   : > { %1113 = vmatmul.bf16.gmra.mxu0 %v793_v12  ;;  %v564_v42 = vpop.f32.mrf.mxu3 }
  0xff   : > { %v773_v28 = vadd.f32 %v2082_v35, %v759_v20  ;;  %v631_v61 = vrot.slane %v564_v42, 1  ;;  %v2266_v42 = vld [vmem:[%s2383_s6] ss:$0 sm:$0xff] }
 0x101   : > { %vm781_vm10 = vcmp.gt.f32.partialorder %v773_v28, 0.0  ;;  %v634_v62 = vsel %vm632_vm2, %v629_v50, %v631_v61  ;;  %v572_v28 = vrot.slane %v2101_v58, 7 }
 0x102   : > { %v703_v27 = vpop.f32.mrf.mxu0  ;;  %v789_v40 = vsel %vm781_vm10, 1.0, %v1545_v53 }
 0x103   : > { %v416_v29 = vpop.f32.mrf.mxu1  ;;  %v704_v30 = vadd.f32 %v703_v27, %v584_v59 }
 0x104   : > { %v582_v34 = vrot.slane %v416_v29, 7 }
 0x105   : > { %v761_v24 = vadd.f32 %v704_v30, %v663_v63  ;;  %v595_v30 = vsel %vm583_vm1, %v570_v49, %v572_v28 }
 0x106   : > { %v599_v38 = vsel %vm583_vm1, %v582_v34, %v568_v25  ;;  %v585_v44 = vsel %vm583_vm1, %v580_v4, %v582_v34  ;;  %v605_v58 = vmul.f32 %v2066_v21, %v595_v30 }
 0x107   : > { %v774_v16 = vadd.f32 %v2082_v35, %v761_v24  ;;  %v601_v6 = vmul.f32 %v2066_v21, %v599_v38 }
 0x109   : > { %vm782_vm11 = vcmp.gt.f32.partialorder %v774_v16, 0.0 }
 0x10a   : > { %v790_v41 = vsel %vm782_vm11, 1.0, %v1545_v53  ;;  %v652_v53 = vmul.f32 %v2086_v37, %v2139_v48  ;;  %v578_v48 = vrot.slane %v2145_v51, 7 }
 0x10b   : > { %v723_v45 = vpop.f32.mrf.mxu1  ;;  %v794_v46 = vpack.c.bf16 %v790_v41, %v789_v40 }
 0x10c   : > { %v724_v47 = vadd.f32 %v723_v45, %v601_v6  ;;  %v587_v0 = vsel %vm583_vm1, %v578_v48, %v580_v4 }
 0x10d   : > { %882 = vmatmul.bf16.gmra.mxu2 %v794_v46  ;;  %993 = vmatmul.bf16.gmra.mxu3 %v794_v46 }
 0x10e   : > { %v2189_v35 = vadd.f32 %v724_v47, %v2126_v26  ;;  %v648_v26 = vsel %vm632_vm2, %v631_v61, %v617_v19  ;;  %v613_v19 = vmul.f32 %v2066_v21, %v587_v0  ;;  %v2253_v47 = vld [vmem:[%s2381_s4] ss:$0 sm:$0xff] }
 0x10f   : > { %v664_v17 = vmul.f32 %v2086_v37, %v648_v26 }
 0x113   : > { %v726_v54 = vpop.f32.mrf.mxu1 }
 0x114   : > { %v727_v55 = vadd.f32 %v726_v54, %v597_v52 }
 0x116   : > { %v750_v60 = vadd.f32 %v727_v55, %v652_v53 }
 0x118   : > { %v1149_v54 = vadd.f32 %v2258_v32, %v750_v60 }
 0x11b   : > { %v729_v13 = vpop.f32.mrf.mxu1 }
 0x11c   : > { %v730_v50 = vadd.f32 %v729_v13, %v605_v58 }
 0x11d   : > { %1118 = vmatmul.bf16.vlgmr.msra.gmra.mxu2 %v794_v46 }
 0x11e   : > { %v752_v13 = vadd.f32 %v730_v50, %v2153_v2 }
 0x123   : > { %v2205_v3 = vpop.f32.mrf.mxu1 }
 0x12b   : > { %v2207_v33 = vpop.f32.mrf.mxu1 }
 0x133   : > { %v2211_v7 = vpop.f32.mrf.mxu1 }
 0x13b   : > { %v741_v8 = vpop.f32.mrf.mxu1 }
 0x13c   : > { %v742_v10 = vadd.f32 %v741_v8, %v613_v19  ;;  %v576_v8 = vrot.slane %v2130_v31, 7 }
 0x13e   : > { %v2218_v12 = vadd.f32 %v742_v10, %v634_v62  ;;  %v574_v62 = vrot.slane %v2113_v11, 7  ;;  %v1150_v11 = vadd.f32 %v2258_v32, %v752_v13 }
 0x143   : > { %v744_v15 = vpop.f32.mrf.mxu1 }
 0x144   : > { %v745_v9 = vadd.f32 %v744_v15, %v585_v44  ;;  %v593_v15 = vsel %vm583_vm1, %v572_v28, %v574_v62  ;;  %v656_v28 = vmul.f32 %v2086_v37, %v2168_v23 }
 0x146   : > { %v2223_v57 = vadd.f32 %v745_v9, %v664_v17  ;;  %v591_v9 = vsel %vm583_vm1, %v574_v62, %v576_v8 }
 0x148   : > { %v1155_v14 = vadd.f32 %v2258_v32, %v2223_v57 }
 0x15b   : > { %v2229_v25 = vpop.f32.mrf.mxu0 }
 0x160   : > { %v2225_v20 = vpop.f32.mrf.mxu2  ;;  %v2227_v22 = vpop.f32.mrf.mxu3 }
 0x161   : > { %v999_v34 = vrot.slane %v2225_v20, 7 }
 0x163   : > { %v1106_v29 = vpop.f32.mrf.mxu0 }
 0x168   : > { %v870_v59 = vpop.f32.mrf.mxu2  ;;  %v2231_v27 = vpop.f32.mrf.mxu3 }
 0x169   : > { %v1000_v63 = vrot.slane %v870_v59, 7  ;;  %v1024_v39 = vrot.slane %v2231_v27, 1 }
 0x16b   : > { %v1013_v38 = vsel %vm583_vm1, %v999_v34, %v1000_v63  ;;  %v1109_v49 = vpop.f32.mrf.mxu0 }
 0x16c   : > { %v1107_v45 = vadd.f32 %v1106_v29, %v1013_v38 }
 0x170   : > { %v873_v24 = vpop.f32.mrf.mxu2  ;;  %v984_v36 = vpop.f32.mrf.mxu3 }
 0x171   : > { %v1001_v16 = vrot.slane %v873_v24, 7  ;;  %v1025_v6 = vrot.slane %v984_v36, 1 }
 0x173   : > { %v1012_v40 = vsel %vm583_vm1, %v1000_v63, %v1001_v16  ;;  %v1036_v41 = vsel %vm632_vm2, %v1024_v39, %v1025_v6  ;;  %v1111_v29 = vpop.f32.mrf.mxu0  ;;  %v733_v63 = vadd.f32 %v2205_v3, %v593_v15 }
 0x174   : > { %v1040_v46 = vmul.f32 %v2086_v37, %v1036_v41  ;;  %v1017_v52 = vmul.f32 %v2066_v21, %v1012_v40  ;;  %v609_v40 = vmul.f32 %v2066_v21, %v591_v9 }
 0x175   : > { %v754_v41 = vadd.f32 %v733_v63, %v656_v28 }
 0x176   : > { %v1125_v53 = vadd.f32 %v1107_v45, %v1040_v46  ;;  %v1110_v19 = vadd.f32 %v1109_v49, %v1017_v52  ;;  %v736_v50 = vadd.f32 %v2207_v33, %v609_v40 }
 0x178   : > { %v1137_v55 = vmul.f32 %v2253_v47, %v1125_v53  ;;  %v875_v61 = vpop.f32.mrf.mxu2  ;;  %v986_v26 = vpop.f32.mrf.mxu3  ;;  %v756_v13 = vadd.f32 %v736_v50, %v2183_v18  ;;  %v1023_v50 = vrot.slane %v2227_v22, 1  ;;  %v1148_v22 = vadd.f32 %v2258_v32, %v2189_v35 }
 0x179   : > { %v1026_v4 = vrot.slane %v986_v26, 1  ;;  %v1002_v17 = vrot.slane %v875_v61, 7 }
 0x17a   : > { %v1157_v0 = vadd.f32 %v1149_v54, %v1137_v55  ;;  %v1151_v54 = vadd.f32 %v2258_v32, %v754_v41  ;;  %v1152_v15 = vadd.f32 %v2258_v32, %v756_v13  ;;  %v1037_v20 = vsel %vm632_vm2, %v1023_v50, %v1024_v39 }
 0x17b   : > { %v1035_v60 = vsel %vm632_vm2, %v1025_v6, %v1026_v4  ;;  %v1011_v38 = vsel %vm583_vm1, %v1001_v16, %v1002_v17  ;;  %v1114_v62 = vpop.f32.mrf.mxu0  ;;  %v1154_v39 = vadd.f32 %v2258_v32, %v2218_v12 }
 0x17c   : > { %vm1165_vm12 = vcmp.gt.f32.partialorder %v1157_v0, 0.0  ;;  %v1177_v10 = vmul.f32 %v2266_v42, %v1157_v0  ;;  %v1126_v44 = vadd.f32 %v1110_v19, %v1035_v60  ;;  %v1112_v45 = vadd.f32 %v1111_v29, %v1011_v38 }
 0x17e   : > { %v1185_v31 = vsel %vm1165_vm12, %v1157_v0, %v1177_v10  ;;  %v1138_v2 = vmul.f32 %v2253_v47, %v1126_v44  ;;  %v589_v10 = vsel %vm583_vm1, %v576_v8, %v578_v48 }
 0x17f   : > { %v1193_v59 = vadd.f32 %v1185_v31, %v1739_v43  ;;  %v660_v31 = vmul.f32 %v2086_v37, %v2193_v1 }
 0x180   : > { %v1158_v30 = vadd.f32 %v1150_v11, %v1138_v2  ;;  %v878_v24 = vpop.f32.mrf.mxu2  ;;  %v989_v36 = vpop.f32.mrf.mxu3  ;;  %v739_v2 = vadd.f32 %v2211_v7, %v589_v10 }
 0x181   : > { %1201 = vst [vmem:[%s2281_s27 + $0x8] sm:$0xff] %v1193_v59  ;;  %v1003_v6 = vrot.slane %v878_v24, 7  ;;  %v1027_v58 = vrot.slane %v989_v36, 1  ;;  %v1531_v24 = vld [vmem:[%s1691_s22 + $0x20] sm:$0xff] }
 0x182   : > { %vm1166_vm13 = vcmp.gt.f32.partialorder %v1158_v30, 0.0  ;;  %v1178_v43 = vmul.f32 %v2266_v42, %v1158_v30  ;;  %v758_v1 = vadd.f32 %v739_v2, %v660_v31  ;;  %v1534_v2 = vld [vmem:[%s1691_s22 + $0x30] sm:$0xff] }
 0x183   : > { %v1010_v23 = vsel %vm583_vm1, %v1002_v17, %v1003_v6  ;;  %v1034_v3 = vsel %vm632_vm2, %v1026_v4, %v1027_v58  ;;  %v1116_v28 = vpop.f32.mrf.mxu0 }
 0x184   : > { %v1186_v46 = vsel %vm1166_vm13, %v1158_v30, %v1178_v43  ;;  %v1042_v49 = vmul.f32 %v2086_v37, %v1034_v3  ;;  %v1019_v52 = vmul.f32 %v2066_v21, %v1010_v23 }
 0x185   : > { %v1194_v16 = vadd.f32 %v1186_v46, %v1781_v56 }
 0x186   : > { %v1127_v53 = vadd.f32 %v1112_v45, %v1042_v49  ;;  %v1115_v19 = vadd.f32 %v1114_v62, %v1019_v52 }
 0x187   : > { %1202 = vst [vmem:[%s2281_s27 + $0x10] sm:$0xff] %v1194_v16 }
 0x188   : > { %v1139_v55 = vmul.f32 %v2253_v47, %v1127_v53  ;;  %v880_v61 = vpop.f32.mrf.mxu2  ;;  %v991_v26 = vpop.f32.mrf.mxu3 }
 0x189   : > { %v1028_v4 = vrot.slane %v991_v26, 1  ;;  %v1004_v44 = vrot.slane %v880_v61, 7 }
 0x18a   : > { %v1159_v0 = vadd.f32 %v1151_v54, %v1139_v55 }
 0x18b   : > { %v1033_v56 = vsel %vm632_vm2, %v1027_v58, %v1028_v4  ;;  %v1009_v48 = vsel %vm583_vm1, %v1003_v6, %v1004_v44  ;;  %v1153_v58 = vadd.f32 %v2258_v32, %v758_v1 }
 0x18c   : > { %vm1167_vm14 = vcmp.gt.f32.partialorder %v1159_v0, 0.0  ;;  %v1179_v33 = vmul.f32 %v2266_v42, %v1159_v0  ;;  %v1128_v60 = vadd.f32 %v1115_v19, %v1033_v56  ;;  %v1117_v63 = vadd.f32 %v1116_v28, %v1009_v48 }
 0x18e   : > { %v1187_v17 = vsel %vm1167_vm14, %v1159_v0, %v1179_v33  ;;  %v1140_v18 = vmul.f32 %v2253_v47, %v1128_v60 }
 0x18f   : > { %v1195_v11 = vadd.f32 %v1187_v17, %v1823_v5 }
 0x190   : > { %v1160_v9 = vadd.f32 %v1152_v15, %v1140_v18  ;;  %v883_v59 = vpop.f32.mrf.mxu2  ;;  %v994_v51 = vpop.f32.mrf.mxu3  ;;  %v1533_v15 = vld [vmem:[%s1691_s22] sm:$0xff] }
 0x191   : > { %1203 = vst [vmem:[%s2281_s27 + $0x18] sm:$0xff] %v1195_v11  ;;  %v1029_v8 = vrot.slane %v994_v51, 1  ;;  %v1005_v6 = vrot.slane %v883_v59, 7 }
 0x192   : > { %vm1168_vm15 = vcmp.gt.f32.partialorder %v1160_v9, 0.0  ;;  %v1180_v29 = vmul.f32 %v2266_v42, %v1160_v9 }
 0x193   : > { %v1032_v5 = vsel %vm632_vm2, %v1028_v4, %v1029_v8  ;;  %v1008_v16 = vsel %vm583_vm1, %v1004_v44, %v1005_v6 }
 0x194   : > { %v1188_v30 = vsel %vm1168_vm15, %v1160_v9, %v1180_v29  ;;  %v1044_v7 = vmul.f32 %v2086_v37, %v1032_v5  ;;  %v1021_v61 = vmul.f32 %v2066_v21, %v1008_v16 }
 0x195   : > { %v1196_v36 = vadd.f32 %v1531_v24, %v1188_v30 }
 0x196   : > { %v1129_v38 = vadd.f32 %v1117_v63, %v1044_v7 }
 0x197   : > { %1204 = vst [vmem:[%s2281_s27 + $0x20] sm:$0xff] %v1196_v36 }
 0x198   : > { %v1141_v40 = vmul.f32 %v2253_v47, %v1129_v38  ;;  %v885_v43 = vpop.f32.mrf.mxu2  ;;  %v996_v45 = vpop.f32.mrf.mxu3 }
 0x199   : > { %v1006_v23 = vrot.slane %v885_v43, 7  ;;  %v1030_v54 = vrot.slane %v996_v45, 1 }
 0x19a   : > { %v1161_v3 = vadd.f32 %v1153_v58, %v1141_v40 }
 0x19b   : > { %v1014_v41 = vsel %vm583_vm1, %v1006_v23, %v999_v34  ;;  %v1532_v34 = vld [vmem:[%s1691_s22 + $0x28] sm:$0xff]  ;;  %v1031_v27 = vsel %vm632_vm2, %v1029_v8, %v1030_v54  ;;  %v1007_v60 = vsel %vm583_vm1, %v1005_v6, %v1006_v23  ;;  %v1535_v8 = vld [vmem:[%s1691_s22 + $0x38] sm:$0xff] }
 0x19c   : > { %vm1169_vm0 = vcmp.gt.f32.partialorder %v1161_v3, 0.0  ;;  %v1181_v46 = vmul.f32 %v2266_v42, %v1161_v3  ;;  %v1015_v49 = vmul.f32 %v2066_v21, %v1014_v41  ;;  %v1038_v21 = vsel %vm632_vm2, %v1030_v54, %v1023_v50 }
 0x19d   : > { %v1046_v10 = vmul.f32 %v2086_v37, %v1038_v21 }
 0x19e   : > { %v1189_v52 = vsel %vm1169_vm0, %v1161_v3, %v1181_v46  ;;  %v1105_v53 = vadd.f32 %v2229_v25, %v1015_v49 }
 0x19f   : > { %v1197_v55 = vadd.f32 %v1532_v34, %v1189_v52 }
 0x1a0   : > { %v1124_v26 = vadd.f32 %v1105_v53, %v1037_v20  ;;  %v1119_v62 = vpop.f32.mrf.mxu2 }
 0x1a1   : > { %1205 = vst [vmem:[%s2281_s27 + $0x28] sm:$0xff] %v1197_v55  ;;  %v1120_v4 = vadd.f32 %v1119_v62, %v1021_v61 }
 0x1a2   : > { %v1136_v25 = vmul.f32 %v2253_v47, %v1124_v26 }
 0x1a3   : > { %v1130_v13 = vadd.f32 %v1120_v4, %v1031_v27 }
 0x1a4   : > { %v1156_v0 = vadd.f32 %v1148_v22, %v1136_v25 }
 0x1a5   : > { %v1142_v19 = vmul.f32 %v2253_v47, %v1130_v13 }
 0x1a6   : > { %vm1164_vm3 = vcmp.gt.f32.partialorder %v1156_v0, 0.0  ;;  %v1176_v35 = vmul.f32 %v2266_v42, %v1156_v0 }
 0x1a7   : > { %v1162_v56 = vadd.f32 %v1154_v39, %v1142_v19 }
 0x1a8   : > { %v1184_v33 = vsel %vm1164_vm3, %v1156_v0, %v1176_v35  ;;  %v1121_v44 = vpop.f32.mrf.mxu2 }
 0x1a9   : > { %v1192_v12 = vadd.f32 %v1533_v15, %v1184_v33  ;;  %vm1170_vm4 = vcmp.gt.f32.partialorder %v1162_v56, 0.0  ;;  %v1182_v17 = vmul.f32 %v2266_v42, %v1162_v56  ;;  %v1122_v18 = vadd.f32 %v1121_v44, %v1007_v60 }
 0x1ab   : > { %1200 = vst [vmem:[%s2281_s27] sm:$0xff] %v1192_v12  ;;  %v1190_v11 = vsel %vm1170_vm4, %v1162_v56, %v1182_v17  ;;  %v1131_v31 = vadd.f32 %v1122_v18, %v1046_v10 }
 0x1ac   : > { %v1198_v9 = vadd.f32 %v1534_v2, %v1190_v11 }
 0x1ad   : > { %v1143_v59 = vmul.f32 %v2253_v47, %v1131_v31 }
 0x1ae   : > { %1206 = vst [vmem:[%s2281_s27 + $0x30] sm:$0xff] %v1198_v9 }
 0x1af   : > { %v1163_v37 = vadd.f32 %v1155_v14, %v1143_v59 }
 0x1b1   : > { %vm1171_vm1 = vcmp.gt.f32.partialorder %v1163_v37, 0.0  ;;  %v1183_v51 = vmul.f32 %v2266_v42, %v1163_v37 }
 0x1b3   : > { %v1191_v48 = vsel %vm1171_vm1, %v1163_v37, %v1183_v51 }
 0x1b4   : > { %v1199_v29 = vadd.f32 %v1535_v8, %v1191_v48 }
 0x1b6   : > { %1207 = vst [vmem:[%s2281_s27 + $0x38] sm:$0xff] %v1199_v29 }
 0x1b7 PF: > { %s17_s24 = sadd.s32 1, %s1542_s24  }
 0x1b8   : > { %p14_p4 = scmp.ge.s32.totalorder %s17_s24, 4  }
 0x1ba   :  { %16 = sbr.rel (!%p14_p4) target bundleno = 1 (0x1), region = 82 }

</bundles_post_ra>
